<compile_context>
chip_gen: v7x
topology: tpu7x:2x2x1
jax: 0.10.0
libtpu: 0.0.40
codegen_flags: <defaults>
</compile_context>

<pallas_src>
import functools

import jax
import jax.numpy as jnp
from jax import lax
from jax.experimental import pallas as pl
from jax.experimental.pallas import tpu as pltpu

USE_NORM = True
BIAS = 0.0          # bias=False in the module -> self.bias = 0 (python scalar)
EPS = 1e-12         # F.normalize default eps


def _softplus(x):
    # numerically stable log(1 + exp(x)) (matches BCEWithLogits' stable form)
    return jnp.maximum(x, 0.0) + jnp.log1p(jnp.exp(-jnp.abs(x)))


def _inv_norm(sumsq):
    # F.normalize: x / max(||x||, eps)  ==  x * rsqrt(max(||x||^2, eps^2))
    return lax.rsqrt(jnp.maximum(sumsq, EPS * EPS))


def discriminator_kernel(ctx_ref, loc_ref, w_ref, out_ref):
    # ctx_ref: (1, 2*TB, C)  rows [0:TB] = pos, [TB:2*TB] = neg of this batch tile
    # loc_ref: (1, 2*TB, L)
    # w_ref  : (C, L)        VMEM-resident across the grid
    # out_ref: (1, 1, TB)    lane-dense per-sample BCE loss
    tb2 = ctx_ref.shape[1]
    tb = tb2 // 2

    ctx = ctx_ref[0]                        # keep input dtype for the MXU
    loc = loc_ref[0].astype(jnp.float32)    # f32 only for the epilogue

    # One fused matmul for pos+neg (disc: Linear(ctx_dim -> loc_dim, bias=False)).
    proj = jnp.dot(ctx, w_ref[...], preferred_element_type=jnp.float32)  # (2TB, L)

    if USE_NORM:
        proj = proj * _inv_norm(jnp.sum(proj * proj, axis=-1, keepdims=True))
        loc = loc * _inv_norm(jnp.sum(loc * loc, axis=-1, keepdims=True))

    # Matcher: per-row dot product. Transpose the elementwise product once (XLU)
    # and reduce over sublanes so scores land lane-dense.
    prod_t = (proj * loc).T                                   # (L, 2*TB)
    scores = jnp.sum(prod_t, axis=0, keepdims=True) + BIAS    # (1, 2*TB)

    sc_pos = scores[:, :tb]
    sc_neg = scores[:, tb:]

    # BCE-with-logits, reduction='none':
    #   target 1 -> softplus(-x);  target 0 -> softplus(x)
    loss = 0.5 * (_softplus(-sc_pos) + _softplus(sc_neg))     # (1, TB)
    out_ref[...] = loss.reshape(1, 1, tb).astype(out_ref.dtype)


def _round_up(x, m):
    return ((x + m - 1) // m) * m


@functools.partial(jax.jit, static_argnames=("block_b",))
def discriminator_forward(ctx_pos, ctx_neg, loc_pos, loc_neg, w, *, block_b=512):
    B, C = ctx_pos.shape
    L = loc_pos.shape[1]
    assert w.shape == (C, L)

    # Batch tile: multiple of 128 (MXU-friendly M, lane-dense output stores).
    tb = min(block_b, _round_up(B, 128))
    b_pad = _round_up(B, tb)
    g = b_pad // tb

    def pad(x):
        return jnp.pad(x, ((0, b_pad - B), (0, 0))) if b_pad != B else x

    # Pack pos/neg of each batch tile together -> one matmul per grid step.
    ctx_all = jnp.concatenate(
        [pad(ctx_pos).reshape(g, tb, C), pad(ctx_neg).reshape(g, tb, C)], axis=1)
    loc_all = jnp.concatenate(
        [pad(loc_pos).reshape(g, tb, L), pad(loc_neg).reshape(g, tb, L)], axis=1)

    itemsize = ctx_all.dtype.itemsize
    cost = pl.CostEstimate(
        flops=2 * (2 * B) * C * L + 8 * B * L,
        transcendentals=8 * B,
        bytes_accessed=(2 * B * (C + L)) * itemsize
        + C * L * w.dtype.itemsize
        + B * 4,
    )

    out = pl.pallas_call(
        discriminator_kernel,
        out_shape=jax.ShapeDtypeStruct((g, 1, tb), jnp.float32),
        grid=(g,),
        in_specs=[
            pl.BlockSpec((1, 2 * tb, C), lambda i: (i, 0, 0)),   # packed ctx tile
            pl.BlockSpec((1, 2 * tb, L), lambda i: (i, 0, 0)),   # packed loc tile
            pl.BlockSpec((C, L), lambda i: (0, 0)),              # weight: resident
        ],
        out_specs=pl.BlockSpec((1, 1, tb), lambda i: (i, 0, 0)),
        compiler_params=pltpu.CompilerParams(
            dimension_semantics=("parallel",)),
        cost_estimate=cost,
    )(ctx_all, loc_all, w)

    # Back to the module's [B, 1] contract.
    return out.reshape(-1)[:B].reshape(B, 1)


def _reference(ctx_pos, ctx_neg, loc_pos, loc_neg, w):
    def score(ctx, loc):
        proj = ctx @ w
        if USE_NORM:
            proj = proj / jnp.maximum(
                jnp.linalg.norm(proj, axis=-1, keepdims=True), EPS)
            loc = loc / jnp.maximum(
                jnp.linalg.norm(loc, axis=-1, keepdims=True), EPS)
        return jnp.sum(proj * loc, axis=-1, keepdims=True)

    sc_pos = score(ctx_pos, loc_pos) + BIAS
    sc_neg = score(ctx_neg, loc_neg) + BIAS
    sp = lambda x: jnp.maximum(x, 0.0) + jnp.log1p(jnp.exp(-jnp.abs(x)))
    return (sp(-sc_pos) + sp(sc_neg)) / 2.0


if __name__ == "__main__":
    B, ctx_dim, loc_dim = 8, 32, 32

    key = jax.random.PRNGKey(0)
    k1, k2, k3, k4, k5 = jax.random.split(key, 5)
    ctx_pos = jax.random.normal(k1, (B, ctx_dim), dtype=jnp.float32)
    ctx_neg = jax.random.normal(k2, (B, ctx_dim), dtype=jnp.float32)
    loc_pos = jax.random.normal(k3, (B, loc_dim), dtype=jnp.float32)
    loc_neg = jax.random.normal(k4, (B, loc_dim), dtype=jnp.float32)
    # Deterministic synthetic weight for nn.Linear(ctx_dim, loc_dim, bias=False)
    w = jax.random.normal(k5, (ctx_dim, loc_dim), dtype=jnp.float32) * (
        1.0 / jnp.sqrt(ctx_dim))

    out = discriminator_forward(ctx_pos, ctx_neg, loc_pos, loc_neg, w)
    out = jax.block_until_ready(out)

    ref = _reference(ctx_pos, ctx_neg, loc_pos, loc_neg, w)
    assert out.shape == (B, 1)
    assert jnp.allclose(out, ref, atol=1e-5, rtol=1e-5)

    print("KERNEL_OK")
</pallas_src>

<mosaic_0001>
module attributes {stable_mosaic.version = 11 : i64} {
  func.func @discriminator_kernel(%arg0: i32, %arg1: memref<1x256x32xf32, #tpu.memory_space<vmem>>, %arg2: memref<1x256x32xf32, #tpu.memory_space<vmem>>, %arg3: memref<32x32xf32, #tpu.memory_space<vmem>>, %arg4: memref<1x1x128xf32, #tpu.memory_space<vmem>>) attributes {dimension_semantics = [#tpu.dimension_semantics<parallel>], iteration_bounds = array<i64: 1>, scalar_prefetch = 0 : i64, scratch_operands = 0 : i64, tpu.core_type = #tpu.core_type<tc>, window_params = [{transform_indices = @transform_0, window_bounds = array<i64: 1, 256, 32>}, {transform_indices = @transform_1, window_bounds = array<i64: 1, 256, 32>}, {pipeline_mode = #tpu.pipeline_mode<synchronous>, transform_indices = @transform_2, window_bounds = array<i64: 32, 32>}, {transform_indices = @transform_3, window_bounds = array<i64: 1, 1, 128>}]} {
    %c0 = arith.constant 0 : index
    %c0_0 = arith.constant 0 : index
    %c0_1 = arith.constant 0 : index
    %0 = vector.load %arg1[%c0, %c0_0, %c0_1] : memref<1x256x32xf32, #tpu.memory_space<vmem>>, vector<1x256x32xf32>
    %1 = vector.shape_cast %0 : vector<1x256x32xf32> to vector<256x32xf32>
    %c0_2 = arith.constant 0 : index
    %c0_3 = arith.constant 0 : index
    %c0_4 = arith.constant 0 : index
    %2 = vector.load %arg2[%c0_2, %c0_3, %c0_4] : memref<1x256x32xf32, #tpu.memory_space<vmem>>, vector<1x256x32xf32>
    %3 = vector.shape_cast %2 : vector<1x256x32xf32> to vector<256x32xf32>
    %c0_5 = arith.constant 0 : index
    %c0_6 = arith.constant 0 : index
    %4 = vector.load %arg3[%c0_5, %c0_6] : memref<32x32xf32, #tpu.memory_space<vmem>>, vector<32x32xf32>
    %cst = arith.constant dense<0.000000e+00> : vector<256x32xf32>
    %5 = tpu.matmul %1, %4, %cst {dimension_numbers = #tpu.dot_dimension_numbers<[1], [0], [0], [1], [0, 0, 1, 1], [], []>} : vector<256x32xf32>, vector<32x32xf32>, vector<256x32xf32> -> vector<256x32xf32>
    %6 = arith.mulf %5, %5 : vector<256x32xf32>
    %cst_7 = arith.constant dense<0.000000e+00> : vector<256xf32>
    %7 = vector.multi_reduction <add>, %6, %cst_7 [1] : vector<256x32xf32> to vector<256xf32>
    %8 = vector.shape_cast %7 : vector<256xf32> to vector<256x1xf32>
    %cst_8 = arith.constant 1.000000e-24 : f32
    %9 = vector.broadcast %cst_8 : f32 to vector<256x1xf32>
    %10 = arith.maximumf %8, %9 : vector<256x1xf32>
    %11 = math.rsqrt %10 : vector<256x1xf32>
    %12 = vector.broadcast %11 : vector<256x1xf32> to vector<256x32xf32>
    %13 = arith.mulf %5, %12 : vector<256x32xf32>
    %14 = arith.mulf %3, %3 : vector<256x32xf32>
    %cst_9 = arith.constant dense<0.000000e+00> : vector<256xf32>
    %15 = vector.multi_reduction <add>, %14, %cst_9 [1] : vector<256x32xf32> to vector<256xf32>
    %16 = vector.shape_cast %15 : vector<256xf32> to vector<256x1xf32>
    %cst_10 = arith.constant 1.000000e-24 : f32
    %17 = vector.broadcast %cst_10 : f32 to vector<256x1xf32>
    %18 = arith.maximumf %16, %17 : vector<256x1xf32>
    %19 = math.rsqrt %18 : vector<256x1xf32>
    %20 = vector.broadcast %19 : vector<256x1xf32> to vector<256x32xf32>
    %21 = arith.mulf %3, %20 : vector<256x32xf32>
    %22 = arith.mulf %13, %21 : vector<256x32xf32>
    %23 = tpu.transpose %22, [1, 0] : vector<256x32xf32> -> vector<32x256xf32>
    %cst_11 = arith.constant dense<0.000000e+00> : vector<256xf32>
    %24 = vector.multi_reduction <add>, %23, %cst_11 [0] : vector<32x256xf32> to vector<256xf32>
    %25 = vector.shape_cast %24 : vector<256xf32> to vector<1x256xf32>
    %cst_12 = arith.constant 0.000000e+00 : f32
    %26 = vector.broadcast %cst_12 : f32 to vector<1x256xf32>
    %27 = arith.addf %25, %26 : vector<1x256xf32>
    %28 = vector.extract_strided_slice %27 {offsets = [0, 0], sizes = [1, 128], strides = [1, 1]} : vector<1x256xf32> to vector<1x128xf32>
    %29 = vector.extract_strided_slice %27 {offsets = [0, 128], sizes = [1, 128], strides = [1, 1]} : vector<1x256xf32> to vector<1x128xf32>
    %cst_13 = arith.constant 0.000000e+00 : f32
    %30 = vector.broadcast %cst_13 : f32 to vector<1x128xf32>
    %31 = arith.subf %30, %28 : vector<1x128xf32>
    %cst_14 = arith.constant 0.000000e+00 : f32
    %32 = vector.broadcast %cst_14 : f32 to vector<1x128xf32>
    %33 = arith.maximumf %31, %32 : vector<1x128xf32>
    %34 = math.absf %31 : vector<1x128xf32>
    %cst_15 = arith.constant 0.000000e+00 : f32
    %35 = vector.broadcast %cst_15 : f32 to vector<1x128xf32>
    %36 = arith.subf %35, %34 : vector<1x128xf32>
    %37 = math.exp %36 : vector<1x128xf32>
    %38 = math.log1p %37 : vector<1x128xf32>
    %39 = arith.addf %33, %38 : vector<1x128xf32>
    %cst_16 = arith.constant 0.000000e+00 : f32
    %40 = vector.broadcast %cst_16 : f32 to vector<1x128xf32>
    %41 = arith.maximumf %29, %40 : vector<1x128xf32>
    %42 = math.absf %29 : vector<1x128xf32>
    %cst_17 = arith.constant 0.000000e+00 : f32
    %43 = vector.broadcast %cst_17 : f32 to vector<1x128xf32>
    %44 = arith.subf %43, %42 : vector<1x128xf32>
    %45 = math.exp %44 : vector<1x128xf32>
    %46 = math.log1p %45 : vector<1x128xf32>
    %47 = arith.addf %41, %46 : vector<1x128xf32>
    %48 = arith.addf %39, %47 : vector<1x128xf32>
    %cst_18 = arith.constant 5.000000e-01 : f32
    %49 = vector.broadcast %cst_18 : f32 to vector<1x128xf32>
    %50 = arith.mulf %49, %48 : vector<1x128xf32>
    %51 = vector.shape_cast %50 : vector<1x128xf32> to vector<1x1x128xf32>
    %c0_19 = arith.constant 0 : index
    %c0_20 = arith.constant 0 : index
    %c0_21 = arith.constant 0 : index
    %52 = vector.load %arg4[%c0_19, %c0_20, %c0_21] : memref<1x1x128xf32, #tpu.memory_space<vmem>>, vector<1x1x128xf32>
    tpu.vector_store %arg4[%c0_19, %c0_20, %c0_21], %51 {strides = array<i32>} : memref<1x1x128xf32, #tpu.memory_space<vmem>>, vector<1x1x128xf32>,
    return
  }
  func.func @transform_0(%arg0: i32) -> (i32, i32, i32) {
    %c0_i32 = arith.constant 0 : i32
    %c0_i32_0 = arith.constant 0 : i32
    %c0_i32_1 = arith.constant 0 : i32
    return %arg0, %c0_i32, %c0_i32_0 : i32, i32, i32
  }
  func.func @transform_1(%arg0: i32) -> (i32, i32, i32) {
    %c0_i32 = arith.constant 0 : i32
    %c0_i32_0 = arith.constant 0 : i32
    %c0_i32_1 = arith.constant 0 : i32
    return %arg0, %c0_i32, %c0_i32_0 : i32, i32, i32
  }
  func.func @transform_2(%arg0: i32) -> (i32, i32) {
    %c0_i32 = arith.constant 0 : i32
    %c0_i32_0 = arith.constant 0 : i32
    %c0_i32_1 = arith.constant 0 : i32
    return %c0_i32, %c0_i32_0 : i32, i32
  }
  func.func @transform_3(%arg0: i32) -> (i32, i32, i32) {
    %c0_i32 = arith.constant 0 : i32
    %c0_i32_0 = arith.constant 0 : i32
    %c0_i32_1 = arith.constant 0 : i32
    return %arg0, %c0_i32, %c0_i32_0 : i32, i32, i32
  }
}

</mosaic_0001>

<bundles_post_ra>
// kernel: discriminator_forward.1
= control target key start
LH: loop header
LB: loop body
LE: loop exit
PB: predicated region body
PF: predicated region fallthrough
CT: control target
= control target key end

     0   :  { %vm82_vm0 = vcmask 261120   ;;  %s2013_s2 = inlined_call_operand.vmem [shape: f32[32,32], index: 2, kind: input, shape index: {}]   ;;  %s2014_s0 = inlined_call_operand.vmem [shape: f32[1,256,32], index: 0, kind: input, shape index: {}]   ;;  %s2015_s1 = inlined_call_operand.vmem [shape: f32[1,256,32], index: 1, kind: input, shape index: {}]   ;;  %s2016_s3 = inlined_call_operand.vmem [shape: f32[1,1,128], index: 3, kind: output, shape index: {}]  }
   0x1   :  { %v78_v0 = vld [vmem:[%s2013_s2] sm:$0xff]  ;;  %v79_v1 = vld [vmem:[%s2013_s2 + $0x8] sm:$0xff]  ;;  %v80_v2 = vld [vmem:[%s2013_s2 + $0x10] sm:$0xff] }
   0x2   :  { %v1130_v3 = vpack.c.bf16 %v79_v1, %v78_v0  ;;  %v81_v4 = vld [vmem:[%s2013_s2 + $0x18] sm:$0xff]  ;;  %v14_v5 = vld [vmem:[%s2014_s0] sm:$0xff]  ;;  %v15_v8 = vld [vmem:[%s2014_s0 + $0x8] sm:$0xff] }
   0x3   :  { %v1134_v6 = vpack.c.bf16 %v81_v4, %v80_v2  ;;  %1082 = vmatprep.mubr.msk.f32.mxu0 %vm82_vm0, %v14_v5  ;;  %v30_v7 = vld [vmem:[%s2014_s0 + $0x80] sm:$0xff]  ;;  %v31_v9 = vld [vmem:[%s2014_s0 + $0x88] sm:$0xff]  ;;  %v16_v10 = vld [vmem:[%s2014_s0 + $0x10] sm:$0xff] }
   0x4   :  { %1131 = vmatprep.subr.bf16.mxu0 %v1130_v3  ;;  %1138 = vmatprep.subr.bf16.mxu1 %v1130_v3  ;;  %v32_v11 = vld [vmem:[%s2014_s0 + $0x90] sm:$0xff]  ;;  %v17_v12 = vld [vmem:[%s2014_s0 + $0x18] sm:$0xff]  ;;  %v1347_v14 = vld [vmem:[%s2015_s1 + $0x80] sm:$0xff] }
   0x5   :  { %1133 = vmatpush3.bf16.msra.mxu0 %v1130_v3  ;;  %1140 = vmatpush3.bf16.msra.mxu1 %v1130_v3  ;;  %v33_v13 = vld [vmem:[%s2014_s0 + $0x98] sm:$0xff]  ;;  %v1352_v15 = vld [vmem:[%s2015_s1] sm:$0xff]  ;;  %v1357_v16 = vld [vmem:[%s2015_s1 + $0x88] sm:$0xff]  ;;  %v644_v19 = vmul.f32 %v1347_v14, %v1347_v14 }
   0x6   :  { %1135 = vmatprep.subr.bf16.mxu0 %v1134_v6  ;;  %1139 = vmatprep.subr.bf16.mxu1 %v1134_v6  ;;  %v18_v17 = vld [vmem:[%s2014_s0 + $0x20] sm:$0xff]  ;;  %v628_v20 = vmul.f32 %v1352_v15, %v1352_v15  ;;  %v1372_v21 = vld [vmem:[%s2015_s1 + $0x8] sm:$0xff]  ;;  %v645_v22 = vmul.f32 %v1357_v16, %v1357_v16  ;;  %v1385_v26 = vld [vmem:[%s2015_s1 + $0x90] sm:$0xff] }
   0x7   :  { %1106 = vmatprep.mubr.msk.f32.mxu1 %vm82_vm0, %v30_v7  ;;  %v34_v18 = vld [vmem:[%s2014_s0 + $0xa0] sm:$0xff]  ;;  %v629_v23 = vmul.f32 %v1372_v21, %v1372_v21  ;;  %v708_v24 = vsel %vm82_vm0, %v644_v19, 0.0  ;;  %v1390_v27 = vld [vmem:[%s2015_s1 + $0x10] sm:$0xff]  ;;  %v19_v28 = vld [vmem:[%s2014_s0 + $0x28] sm:$0xff]  ;;  %v646_v34 = vmul.f32 %v1385_v26, %v1385_v26 }
   0x8   :  { %v660_v25 = vsel %vm82_vm0, %v628_v20, 0.0  ;;  %v35_v29 = vld [vmem:[%s2014_s0 + $0xa8] sm:$0xff]  ;;  %v20_v30 = vld [vmem:[%s2014_s0 + $0x30] sm:$0xff]  ;;  %709 = vadd.xlane.f32.xlu1 %v708_v24  ;;  %v711_v32 = vsel %vm82_vm0, %v645_v22, 0.0  ;;  %v630_v35 = vmul.f32 %v1390_v27, %v1390_v27  ;;  %v1417_v36 = vld [vmem:[%s2015_s1 + $0x98] sm:$0xff] }
   0x9   :  { %1137 = vmatpush3.bf16.msra.mxu0 %v1134_v6  ;;  %1141 = vmatpush3.bf16.msra.mxu1 %v1134_v6  ;;  %v36_v31 = vld [vmem:[%s2014_s0 + $0xb0] sm:$0xff]  ;;  %v663_v33 = vsel %vm82_vm0, %v629_v23, 0.0  ;;  %v1422_v37 = vld [vmem:[%s2015_s1 + $0x18] sm:$0xff]  ;;  %v22_v40 = vld [vmem:[%s2014_s0 + $0x40] sm:$0xff]  ;;  %v714_v42 = vsel %vm82_vm0, %v646_v34, 0.0  ;;  %v647_v44 = vmul.f32 %v1417_v36, %v1417_v36 }
   0xa   :  { %661 = vadd.xlane.f32.xlu0 %v660_v25  ;;  %v21_v38 = vld [vmem:[%s2014_s0 + $0x38] sm:$0xff]  ;;  %v38_v41 = vld [vmem:[%s2014_s0 + $0xc0] sm:$0xff]  ;;  %v666_v43 = vsel %vm82_vm0, %v630_v35, 0.0  ;;  %v631_v45 = vmul.f32 %v1422_v37, %v1422_v37  ;;  %v23_v48 = vld [vmem:[%s2014_s0 + $0x48] sm:$0xff] }
   0xb   :  { %v37_v39 = vld [vmem:[%s2014_s0 + $0xb8] sm:$0xff]  ;;  %v1449_v46 = vld [vmem:[%s2015_s1 + $0xa0] sm:$0xff]  ;;  %v39_v49 = vld [vmem:[%s2014_s0 + $0xc8] sm:$0xff]  ;;  %v717_v52 = vsel %vm82_vm0, %v647_v44, 0.0 }
   0xc   :  { %1083 = vmatmul.mubr.msk.f32.vlgmr.msra.gmra.mrb[0].mxu0 %vm82_vm0, %v15_v8  ;;  %1107 = vmatmul.mubr.msk.f32.vlgmr.msra.gmra.mrb[0].mxu1 %vm82_vm0, %v31_v9  ;;  %v1454_v47 = vld [vmem:[%s2015_s1 + $0x20] sm:$0xff]  ;;  %v24_v50 = vld [vmem:[%s2014_s0 + $0x50] sm:$0xff]  ;;  %v669_v53 = vsel %vm82_vm0, %v631_v45, 0.0  ;;  %v648_v54 = vmul.f32 %v1449_v46, %v1449_v46  ;;  %v1481_v56 = vld [vmem:[%s2015_s1 + $0xa8] sm:$0xff] }
   0xd   :  { %1085 = vmatprep.mubr.msk.f32.mxu0 %vm82_vm0, %v16_v10  ;;  %1109 = vmatprep.mubr.msk.f32.mxu1 %vm82_vm0, %v32_v11  ;;  %v40_v51 = vld [vmem:[%s2014_s0 + $0xd0] sm:$0xff]  ;;  %v632_v55 = vmul.f32 %v1454_v47, %v1454_v47  ;;  %v1486_v57 = vld [vmem:[%s2015_s1 + $0x28] sm:$0xff]  ;;  %v25_v58 = vld [vmem:[%s2014_s0 + $0x58] sm:$0xff]  ;;  %v649_v0 = vmul.f32 %v1481_v56, %v1481_v56 }
   0xe   :  { %712 = vadd.xlane.f32.xlu1 %v711_v32  ;;  %664 = vadd.xlane.f32.xlu0 %v663_v33  ;;  %v41_v59 = vld [vmem:[%s2014_s0 + $0xd8] sm:$0xff]  ;;  %v26_v60 = vld [vmem:[%s2014_s0 + $0x60] sm:$0xff]  ;;  %v720_v62 = vsel %vm82_vm0, %v648_v54, 0.0  ;;  %v633_v1 = vmul.f32 %v1486_v57, %v1486_v57  ;;  %v1513_v2 = vld [vmem:[%s2015_s1 + $0xb0] sm:$0xff] }
   0xf   :  { %v42_v61 = vld [vmem:[%s2014_s0 + $0xe0] sm:$0xff]  ;;  %v672_v63 = vsel %vm82_vm0, %v632_v55, 0.0  ;;  %2049 = vst [vmem:[#allocation2_spill] sm:$0xff] %v1513_v2  ;;  %v1518_v3 = vld [vmem:[%s2015_s1 + $0x30] sm:$0xff]  ;;  %v27_v4 = vld [vmem:[%s2014_s0 + $0x68] sm:$0xff]  ;;  %v723_v8 = vsel %vm82_vm0, %v649_v0, 0.0  ;;  %v650_v10 = vmul.f32 %v1513_v2, %v1513_v2 }
  0x10   :  { %1086 = vmatmul.mubr.msk.f32.gmra.mrb[2].mxu0 %vm82_vm0, %v17_v12  ;;  %1110 = vmatmul.mubr.msk.f32.gmra.mrb[2].mxu1 %vm82_vm0, %v33_v13  ;;  %v43_v5 = vld [vmem:[%s2014_s0 + $0xe8] sm:$0xff]  ;;  %v28_v6 = vld [vmem:[%s2014_s0 + $0x70] sm:$0xff]  ;;  %v675_v9 = vsel %vm82_vm0, %v633_v1, 0.0  ;;  %v634_v11 = vmul.f32 %v1518_v3, %v1518_v3  ;;  %v1545_v12 = vld [vmem:[%s2015_s1 + $0xb8] sm:$0xff] }
  0x11   :  { %1088 = vmatprep.mubr.msk.f32.mxu0 %vm82_vm0, %v18_v17  ;;  %1112 = vmatprep.mubr.msk.f32.mxu1 %vm82_vm0, %v34_v18  ;;  %v44_v7 = vld [vmem:[%s2014_s0 + $0xf0] sm:$0xff]  ;;  %2050 = vst [vmem:[#allocation3_spill] sm:$0xff] %v1545_v12  ;;  %v1550_v13 = vld [vmem:[%s2015_s1 + $0x38] sm:$0xff]  ;;  %v726_v19 = vsel %vm82_vm0, %v650_v10, 0.0  ;;  %v651_v22 = vmul.f32 %v1545_v12, %v1545_v12  ;;  %v1571_v24 = vld [vmem:[%s2015_s1 + $0xc0] sm:$0xff] }
  0x12   :  { %715 = vadd.xlane.f32.xlu1 %v714_v42  ;;  %667 = vadd.xlane.f32.xlu0 %v666_v43  ;;  %v29_v17 = vld [vmem:[%s2014_s0 + $0x78] sm:$0xff]  ;;  %v678_v20 = vsel %vm82_vm0, %v634_v11, 0.0  ;;  %v635_v23 = vmul.f32 %v1550_v13, %v1550_v13  ;;  %2051 = vst [vmem:[#allocation4_spill] sm:$0xff] %v1571_v24  ;;  %v1576_v25 = vld [vmem:[%s2015_s1 + $0x40] sm:$0xff]  ;;  %v1587_v32 = vld [vmem:[%s2015_s1 + $0xc8] sm:$0xff] }
  0x13   :  { %v45_v18 = vld [vmem:[%s2014_s0 + $0xf8] sm:$0xff]  ;;  %2052 = vst [vmem:[#allocation5_spill] sm:$0xff] %v1576_v25  ;;  %2053 = vst [vmem:[#allocation6_spill] sm:$0xff] %v1587_v32  ;;  %v1592_v33 = vld [vmem:[%s2015_s1 + $0x48] sm:$0xff] }
  0x14   :  { %1089 = vmatmul.mubr.msk.f32.gmra.mrb[4].mxu0 %vm82_vm0, %v19_v28  ;;  %1113 = vmatmul.mubr.msk.f32.gmra.mrb[4].mxu1 %vm82_vm0, %v35_v29  ;;  %v729_v28 = vsel %vm82_vm0, %v651_v22, 0.0  ;;  %v681_v29 = vsel %vm82_vm0, %v635_v23, 0.0  ;;  %2054 = vst [vmem:[#allocation7_spill] sm:$0xff] %v1592_v33  ;;  %v74_v54 = vld [vmem:[%s2015_s1 + $0xe0] sm:$0xff]  ;;  %v1677_v23 = vld [vmem:[%s2015_s1 + $0x78] sm:$0xff] }
  0x15   :  { %1091 = vmatprep.mubr.msk.f32.mxu0 %vm82_vm0, %v20_v30  ;;  %1115 = vmatprep.mubr.msk.f32.mxu1 %vm82_vm0, %v36_v31  ;;  %v652_v30 = vmul.f32 %v1571_v24, %v1571_v24  ;;  %v636_v31 = vmul.f32 %v1576_v25, %v1576_v25  ;;  %v1638_v55 = vld [vmem:[%s2015_s1 + $0x60] sm:$0xff]  ;;  %2062 = vst [vmem:[#allocation15_spill] sm:$0xff] %v1677_v23 }
  0x16   :  { %718 = vadd.xlane.f32.xlu1 %v717_v52  ;;  %670 = vadd.xlane.f32.xlu0 %v669_v53  ;;  %2059 = vst [vmem:[#allocation12_spill] sm:$0xff] %v1638_v55 }
  0x17   :  { %v732_v34 = vsel %vm82_vm0, %v652_v30, 0.0  ;;  %v684_v35 = vsel %vm82_vm0, %v636_v31, 0.0 }
  0x18   :  { %1092 = vmatmul.mubr.msk.f32.gmra.mrb[6].mxu0 %vm82_vm0, %v21_v38  ;;  %1116 = vmatmul.mubr.msk.f32.gmra.mrb[6].mxu1 %vm82_vm0, %v37_v39  ;;  %v653_v38 = vmul.f32 %v1587_v32, %v1587_v32  ;;  %v637_v39 = vmul.f32 %v1592_v33, %v1592_v33 }
  0x19   :  { %1094 = vmatprep.mubr.msk.f32.mxu0 %vm82_vm0, %v22_v40  ;;  %1118 = vmatprep.mubr.msk.f32.mxu1 %vm82_vm0, %v38_v41  ;;  %v1603_v40 = vld [vmem:[%s2015_s1 + $0xd0] sm:$0xff] }
  0x1a   :  { %721 = vadd.xlane.f32.xlu1 %v720_v62  ;;  %673 = vadd.xlane.f32.xlu0 %v672_v63  ;;  %2055 = vst [vmem:[#allocation8_spill] sm:$0xff] %v1603_v40  ;;  %v1608_v41 = vld [vmem:[%s2015_s1 + $0x50] sm:$0xff]  ;;  %v735_v42 = vsel %vm82_vm0, %v653_v38, 0.0  ;;  %v687_v43 = vsel %vm82_vm0, %v637_v39, 0.0  ;;  %v654_v44 = vmul.f32 %v1603_v40, %v1603_v40  ;;  %v1647_v62 = vld [vmem:[%s2015_s1 + $0xe8] sm:$0xff] }
  0x1b   :  { %2056 = vst [vmem:[#allocation9_spill] sm:$0xff] %v1608_v41  ;;  %v638_v45 = vmul.f32 %v1608_v41, %v1608_v41  ;;  %2060 = vst [vmem:[#allocation13_spill] sm:$0xff] %v1647_v62  ;;  %v1652_v63 = vld [vmem:[%s2015_s1 + $0x68] sm:$0xff] }
  0x1c   :  { %1095 = vmatmul.mubr.msk.f32.gmra.mrb[8].mxu0 %vm82_vm0, %v23_v48  ;;  %1119 = vmatmul.mubr.msk.f32.gmra.mrb[8].mxu1 %vm82_vm0, %v39_v49  ;;  %v1619_v48 = vld [vmem:[%s2015_s1 + $0xd8] sm:$0xff]  ;;  %2061 = vst [vmem:[#allocation14_spill] sm:$0xff] %v1652_v63 }
  0x1d   :  { %1097 = vmatprep.mubr.msk.f32.mxu0 %vm82_vm0, %v24_v50  ;;  %1121 = vmatprep.mubr.msk.f32.mxu1 %vm82_vm0, %v40_v51  ;;  %2057 = vst [vmem:[#allocation10_spill] sm:$0xff] %v1619_v48  ;;  %v1624_v49 = vld [vmem:[%s2015_s1 + $0x58] sm:$0xff]  ;;  %v738_v50 = vsel %vm82_vm0, %v654_v44, 0.0  ;;  %v690_v51 = vsel %vm82_vm0, %v638_v45, 0.0  ;;  %v655_v52 = vmul.f32 %v1619_v48, %v1619_v48 }
  0x1e   :  { %724 = vadd.xlane.f32.xlu1 %v723_v8  ;;  %676 = vadd.xlane.f32.xlu0 %v675_v9  ;;  %2058 = vst [vmem:[#allocation11_spill] sm:$0xff] %v1624_v49  ;;  %v639_v53 = vmul.f32 %v1624_v49, %v1624_v49 }
  0x20   :  { %1098 = vmatmul.mubr.msk.f32.gmra.mrb[10].mxu0 %vm82_vm0, %v25_v58  ;;  %1122 = vmatmul.mubr.msk.f32.gmra.mrb[10].mxu1 %vm82_vm0, %v41_v59  ;;  %v741_v58 = vsel %vm82_vm0, %v655_v52, 0.0  ;;  %v693_v59 = vsel %vm82_vm0, %v639_v53, 0.0 }
  0x21   :  { %1100 = vmatprep.mubr.msk.f32.mxu0 %vm82_vm0, %v26_v60  ;;  %1124 = vmatprep.mubr.msk.f32.mxu1 %vm82_vm0, %v42_v61  ;;  %v656_v60 = vmul.f32 %v74_v54, %v74_v54  ;;  %v640_v61 = vmul.f32 %v1638_v55, %v1638_v55 }
  0x22   :  { %727 = vadd.xlane.f32.xlu1 %v726_v19  ;;  %679 = vadd.xlane.f32.xlu0 %v678_v20 }
  0x23   :  { %v744_v0 = vsel %vm82_vm0, %v656_v60, 0.0  ;;  %v696_v1 = vsel %vm82_vm0, %v640_v61, 0.0 }
  0x24   :  { %1101 = vmatmul.mubr.msk.f32.gmra.mrb[12].mxu0 %vm82_vm0, %v27_v4  ;;  %1125 = vmatmul.mubr.msk.f32.gmra.mrb[12].mxu1 %vm82_vm0, %v43_v5  ;;  %v657_v4 = vmul.f32 %v1647_v62, %v1647_v62  ;;  %v641_v5 = vmul.f32 %v1652_v63, %v1652_v63 }
  0x25   :  { %1103 = vmatprep.mubr.msk.f32.mxu0 %vm82_vm0, %v28_v6  ;;  %1127 = vmatprep.mubr.msk.f32.mxu1 %vm82_vm0, %v44_v7  ;;  %v76_v6 = vld [vmem:[%s2015_s1 + $0xf0] sm:$0xff] }
  0x26   :  { %730 = vadd.xlane.f32.xlu1 %v729_v28  ;;  %682 = vadd.xlane.f32.xlu0 %v681_v29  ;;  %v60_v7 = vld [vmem:[%s2015_s1 + $0x70] sm:$0xff]  ;;  %v747_v8 = vsel %vm82_vm0, %v657_v4, 0.0  ;;  %v699_v9 = vsel %vm82_vm0, %v641_v5, 0.0  ;;  %v658_v10 = vmul.f32 %v76_v6, %v76_v6  ;;  %v643_v28 = vmul.f32 %v1677_v23, %v1677_v23 }
  0x27   :  { %v642_v11 = vmul.f32 %v60_v7, %v60_v7 }
  0x28   :  { %1104 = vmatmul.mubr.msk.f32.gmra.mrb[14].mxu0 %vm82_vm0, %v29_v17  ;;  %1128 = vmatmul.mubr.msk.f32.gmra.mrb[14].mxu1 %vm82_vm0, %v45_v18  ;;  %v77_v17 = vld [vmem:[%s2015_s1 + $0xf8] sm:$0xff]  ;;  %v750_v18 = vsel %vm82_vm0, %v658_v10, 0.0  ;;  %v705_v29 = vsel %vm82_vm0, %v643_v28, 0.0 }
  0x29   :  { %v702_v19 = vsel %vm82_vm0, %v642_v11, 0.0  ;;  %v659_v20 = vmul.f32 %v77_v17, %v77_v17 }
  0x2a   :  { %733 = vadd.xlane.f32.xlu1 %v732_v34  ;;  %685 = vadd.xlane.f32.xlu0 %v684_v35 }
  0x2b   :  { %v753_v22 = vsel %vm82_vm0, %v659_v20, 0.0 }
  0x2e   :  { %736 = vadd.xlane.f32.xlu1 %v735_v42  ;;  %688 = vadd.xlane.f32.xlu0 %v687_v43 }
  0x32   :  { %739 = vadd.xlane.f32.xlu1 %v738_v50  ;;  %691 = vadd.xlane.f32.xlu0 %v690_v51 }
  0x36   :  { %742 = vadd.xlane.f32.xlu1 %v741_v58  ;;  %694 = vadd.xlane.f32.xlu0 %v693_v59 }
  0x3a   :  { %745 = vadd.xlane.f32.xlu1 %v744_v0  ;;  %697 = vadd.xlane.f32.xlu0 %v696_v1 }
  0x3e   :  { %748 = vadd.xlane.f32.xlu1 %v747_v8  ;;  %700 = vadd.xlane.f32.xlu0 %v699_v9 }
  0x42   :  { %751 = vadd.xlane.f32.xlu1 %v750_v18  ;;  %703 = vadd.xlane.f32.xlu0 %v702_v19 }
  0x46   :  { %754 = vadd.xlane.f32.xlu1 %v753_v22  ;;  %706 = vadd.xlane.f32.xlu0 %v705_v29 }
  0xdf   :  { %v1682_v30 = vpop.f32.mrb[0].mxu0  ;;  %v1684_v31 = vpop.f32.mrb[0].mxu1 }
  0xe0   :  { %v405_v34 = vmul.f32 %v1682_v30, %v1682_v30  ;;  %v1688_v35 = vpop.f32.mrb[1].mxu0  ;;  %v421_v38 = vmul.f32 %v1684_v31, %v1684_v31  ;;  %v1692_v39 = vpop.f32.mrb[1].mxu1 }
  0xe1   :  { %v404_v42 = vmul.f32 %v1688_v35, %v1688_v35  ;;  %v420_v58 = vmul.f32 %v1692_v39, %v1692_v39 }
  0xe2   :  { %v439_v43 = vsel %vm82_vm0, %v405_v34, 0.0  ;;  %v487_v53 = vsel %vm82_vm0, %v421_v38, 0.0 }
  0xe3   :  { %440 = vadd.xlane.f32.xlu1 %v439_v43  ;;  %v436_v44 = vsel %vm82_vm0, %v404_v42, 0.0  ;;  %v1698_v45 = vpop.f32.mrb[2].mxu0  ;;  %v1700_v50 = vpop.f32.mrb[2].mxu1  ;;  %v484_v7 = vsel %vm82_vm0, %v420_v58, 0.0 }
  0xe4   :  { %437 = vadd.xlane.f32.xlu0 %v436_v44  ;;  %v407_v51 = vmul.f32 %v1698_v45, %v1698_v45  ;;  %v1704_v52 = vpop.f32.mrb[3].mxu0  ;;  %v1707_v54 = vpop.f32.mrb[3].mxu1  ;;  %v423_v1 = vmul.f32 %v1700_v50, %v1700_v50 }
  0xe5   :  { %v406_v60 = vmul.f32 %v1704_v52, %v1704_v52  ;;  %v422_v20 = vmul.f32 %v1707_v54, %v1707_v54 }
  0xe6   :  { %v445_v59 = vsel %vm82_vm0, %v407_v51, 0.0  ;;  %v493_v11 = vsel %vm82_vm0, %v423_v1, 0.0 }
  0xe7   :  { %488 = vadd.xlane.f32.xlu1 %v487_v53  ;;  %v1714_v61 = vpop.f32.mrb[4].mxu0  ;;  %v1716_v0 = vpop.f32.mrb[4].mxu1  ;;  %v442_v8 = vsel %vm82_vm0, %v406_v60, 0.0  ;;  %v490_v44 = vsel %vm82_vm0, %v422_v20, 0.0 }
  0xe8   :  { %446 = vadd.xlane.f32.xlu0 %v445_v59  ;;  %v1720_v4 = vpop.f32.mrb[5].mxu0  ;;  %v1722_v5 = vpop.f32.mrb[5].mxu1  ;;  %v409_v6 = vmul.f32 %v1714_v61, %v1714_v61  ;;  %v425_v34 = vmul.f32 %v1716_v0, %v1716_v0 }
  0xe9   :  { %v408_v22 = vmul.f32 %v1720_v4, %v1720_v4 }
  0xea   :  { %v451_v19 = vsel %vm82_vm0, %v409_v6, 0.0  ;;  %v499_v59 = vsel %vm82_vm0, %v425_v34, 0.0 }
  0xeb   :  { %485 = vadd.xlane.f32.xlu1 %v484_v7  ;;  %v1728_v9 = vpop.f32.mrb[6].mxu0  ;;  %v1730_v10 = vpop.f32.mrb[6].mxu1  ;;  %v448_v51 = vsel %vm82_vm0, %v408_v22, 0.0  ;;  %v424_v7 = vmul.f32 %v1722_v5, %v1722_v5 }
  0xec   :  { %2063 = vst [vmem:[#allocation16_spill] sm:$0xff] %v1730_v10  ;;  %443 = vadd.xlane.f32.xlu0 %v442_v8  ;;  %v1733_v17 = vpop.f32.mrb[7].mxu0  ;;  %v1735_v18 = vpop.f32.mrb[7].mxu1  ;;  %v411_v43 = vmul.f32 %v1728_v9, %v1728_v9  ;;  %v427_v20 = vmul.f32 %v1730_v10, %v1730_v10 }
  0xed   :  { %2064 = vst [vmem:[#allocation17_spill] sm:$0xff] %v1735_v18  ;;  %v410_v8 = vmul.f32 %v1733_v17, %v1733_v17  ;;  %v426_v63 = vmul.f32 %v1735_v18, %v1735_v18 }
  0xee   :  { %v457_v6 = vsel %vm82_vm0, %v411_v43, 0.0 }
  0xef   :  { %494 = vadd.xlane.f32.xlu1 %v493_v11  ;;  %v1742_v28 = vpop.f32.mrb[8].mxu0  ;;  %v1744_v29 = vpop.f32.mrb[8].mxu1 }
  0xf0   :  { %2065 = vst [vmem:[#allocation18_spill] sm:$0xff] %v1742_v28  ;;  %2066 = vst [vmem:[#allocation19_spill] sm:$0xff] %v1744_v29  ;;  %452 = vadd.xlane.f32.xlu0 %v451_v19  ;;  %v1748_v38 = vpop.f32.mrb[9].mxu0  ;;  %v1750_v42 = vpop.f32.mrb[9].mxu1  ;;  %v413_v43 = vmul.f32 %v1742_v28, %v1742_v28 }
  0xf1   :  { %2067 = vst [vmem:[#allocation20_spill] sm:$0xff] %v1748_v38  ;;  %2068 = vst [vmem:[#allocation21_spill] sm:$0xff] %v1750_v42 }
  0xf2   :  { %v463_v40 = vsel %vm82_vm0, %v413_v43, 0.0 }
  0xf3   :  { %491 = vadd.xlane.f32.xlu1 %v490_v44  ;;  %v1756_v53 = vpop.f32.mrb[10].mxu0  ;;  %v1758_v58 = vpop.f32.mrb[10].mxu1  ;;  %v496_v44 = vsel %vm82_vm0, %v424_v7, 0.0  ;;  %v412_v7 = vmul.f32 %v1748_v38, %v1748_v38 }
  0xf4   :  { %2069 = vst [vmem:[#allocation22_spill] sm:$0xff] %v1756_v53  ;;  %2070 = vst [vmem:[#allocation23_spill] sm:$0xff] %v1758_v58  ;;  %449 = vadd.xlane.f32.xlu0 %v448_v51  ;;  %v1761_v60 = vpop.f32.mrb[11].mxu0  ;;  %v1763_v1 = vpop.f32.mrb[11].mxu1  ;;  %v454_v51 = vsel %vm82_vm0, %v410_v8, 0.0  ;;  %v429_v8 = vmul.f32 %v1744_v29, %v1744_v29  ;;  %v431_v41 = vmul.f32 %v1758_v58, %v1758_v58 }
  0xf5   :  { %2071 = vst [vmem:[#allocation24_spill] sm:$0xff] %v1761_v60  ;;  %2072 = vst [vmem:[#allocation25_spill] sm:$0xff] %v1763_v1 }
  0xf6   :  { %v511_v43 = vsel %vm82_vm0, %v429_v8, 0.0 }
  0xf7   :  { %500 = vadd.xlane.f32.xlu1 %v499_v59  ;;  %v1770_v11 = vpop.f32.mrb[12].mxu0  ;;  %v1772_v19 = vpop.f32.mrb[12].mxu1 }
  0xf8   :  { %2073 = vst [vmem:[#allocation26_spill] sm:$0xff] %v1770_v11  ;;  %2074 = vst [vmem:[#allocation27_spill] sm:$0xff] %v1772_v19  ;;  %458 = vadd.xlane.f32.xlu0 %v457_v6  ;;  %v1776_v22 = vpop.f32.mrb[13].mxu0  ;;  %v1778_v34 = vpop.f32.mrb[13].mxu1  ;;  %v505_v6 = vsel %vm82_vm0, %v427_v20, 0.0  ;;  %v415_v20 = vmul.f32 %v1756_v53, %v1756_v53 }
  0xf9   :  { %2075 = vst [vmem:[#allocation28_spill] sm:$0xff] %v1776_v22  ;;  %2076 = vst [vmem:[#allocation29_spill] sm:$0xff] %v1778_v34 }
  0xfa   :  { %v469_v48 = vsel %vm82_vm0, %v415_v20, 0.0  ;;  %v517_v20 = vsel %vm82_vm0, %v431_v41, 0.0 }
  0xfb   :  { %497 = vadd.xlane.f32.xlu1 %v496_v44  ;;  %v1784_v59 = vpop.f32.mrb[14].mxu0  ;;  %v1786_v23 = vpop.f32.mrb[14].mxu1  ;;  %v502_v44 = vsel %vm82_vm0, %v426_v63, 0.0  ;;  %v417_v63 = vmul.f32 %v1770_v11, %v1770_v11 }
  0xfc   :  { %2077 = vst [vmem:[#allocation30_spill] sm:$0xff] %v1784_v59  ;;  %2078 = vst [vmem:[#allocation31_spill] sm:$0xff] %v1786_v23  ;;  %455 = vadd.xlane.f32.xlu0 %v454_v51  ;;  %v1789_v62 = vpop.f32.mrb[15].mxu0  ;;  %v1791_v55 = vpop.f32.mrb[15].mxu1  ;;  %v460_v51 = vsel %vm82_vm0, %v412_v7, 0.0 }
  0xfd   :  { %2079 = vst [vmem:[#allocation32_spill] sm:$0xff] %v1789_v62  ;;  %2080 = vst [vmem:[#allocation33_spill] sm:$0xff] %v1791_v55 }
  0xff   :  { %506 = vadd.xlane.f32.xlu1 %v505_v6  ;;  %v428_v6 = vmul.f32 %v1750_v42, %v1750_v42 }
 0x100   :  { %464 = vadd.xlane.f32.xlu0 %v463_v40  ;;  %v414_v40 = vmul.f32 %v1761_v60, %v1761_v60 }
 0x101   :  { %v508_v7 = vsel %vm82_vm0, %v428_v6, 0.0  ;;  %v710_v6 = vpop.xlane.xlu1 %709 }
 0x102   :  { %v466_v8 = vsel %vm82_vm0, %v414_v40, 0.0  ;;  %v419_v40 = vmul.f32 %v1784_v59, %v1784_v59  ;;  %v772_v2 = vmax.f32 %v710_v6, 1e-24 }
 0x103   :  { %503 = vadd.xlane.f32.xlu1 %v502_v44  ;;  %v475_v44 = vsel %vm82_vm0, %v417_v63, 0.0 }
 0x104   :  { %461 = vadd.xlane.f32.xlu0 %v460_v51  ;;  %v430_v51 = vmul.f32 %v1763_v1, %v1763_v1  ;;  %1142 = vrsqrt.f32 %v772_v2 }
 0x106   :  { %v514_v41 = vsel %vm82_vm0, %v430_v51, 0.0 }
 0x107   :  { %512 = vadd.xlane.f32.xlu1 %v511_v43  ;;  %v433_v43 = vmul.f32 %v1772_v19, %v1772_v19  ;;  %v432_v19 = vmul.f32 %v1778_v34, %v1778_v34 }
 0x108   :  { %470 = vadd.xlane.f32.xlu0 %v469_v48  ;;  %v416_v48 = vmul.f32 %v1776_v22, %v1776_v22  ;;  %v713_v22 = vpop.xlane.xlu1 %712 }
 0x109   :  { %v773_v33 = vmax.f32 %v713_v22, 1e-24 }
 0x10a   :  { %v472_v63 = vsel %vm82_vm0, %v416_v48, 0.0  ;;  %v434_v48 = vmul.f32 %v1791_v55, %v1791_v55 }
 0x10b   :  { %509 = vadd.xlane.f32.xlu1 %v508_v7  ;;  %v662_v7 = vpop.xlane.xlu0 %661 }
 0x10c   :  { %467 = vadd.xlane.f32.xlu0 %v466_v8  ;;  %v523_v8 = vsel %vm82_vm0, %v433_v43, 0.0  ;;  %v418_v43 = vmul.f32 %v1789_v62, %v1789_v62  ;;  %v756_v18 = vmax.f32 %v662_v7, 1e-24 }
 0x10e   :  { %1144 = vrsqrt.f32 %v756_v18 }
 0x10f   :  { %518 = vadd.xlane.f32.xlu1 %v517_v20  ;;  %v435_v20 = vmul.f32 %v1786_v23, %v1786_v23  ;;  %v665_v59 = vpop.xlane.xlu0 %664  ;;  %v526_v23 = vsel %vm82_vm0, %v434_v48, 0.0  ;;  %1146 = vrsqrt.f32 %v773_v33 }
 0x110   :  { %476 = vadd.xlane.f32.xlu0 %v475_v44  ;;  %v481_v44 = vsel %vm82_vm0, %v419_v40, 0.0  ;;  %v716_v40 = vpop.xlane.xlu1 %715  ;;  %v757_v12 = vmax.f32 %v665_v59, 1e-24 }
 0x111   :  { %v529_v51 = vsel %vm82_vm0, %v435_v20, 0.0 }
 0x112   :  { %1148 = vrsqrt.f32 %v757_v12 }
 0x113   :  { %515 = vadd.xlane.f32.xlu1 %v514_v41  ;;  %v520_v41 = vsel %vm82_vm0, %v432_v19, 0.0 }
 0x114   :  { %473 = vadd.xlane.f32.xlu0 %v472_v63  ;;  %v668_v63 = vpop.xlane.xlu0 %667 }
 0x117   :  { %524 = vadd.xlane.f32.xlu1 %v523_v8  ;;  %v478_v8 = vsel %vm82_vm0, %v418_v43, 0.0 }
 0x118   :  { %482 = vadd.xlane.f32.xlu0 %v481_v44  ;;  %v719_v44 = vpop.xlane.xlu1 %718  ;;  %v671_v20 = vpop.xlane.xlu0 %670 }
 0x11b   :  { %521 = vadd.xlane.f32.xlu1 %v520_v41 }
 0x11c   :  { %530 = vadd.xlane.f32.xlu0 %v529_v51  ;;  %v722_v34 = vpop.xlane.xlu1 %721  ;;  %v674_v1 = vpop.xlane.xlu0 %673 }
 0x11d   :  { %v776_v22 = vmax.f32 %v722_v34, 1e-24  ;;  %v760_v2 = vmax.f32 %v674_v1, 1e-24 }
 0x11f   :  { %527 = vadd.xlane.f32.xlu1 %v526_v23 }
 0x120   :  { %479 = vadd.xlane.f32.xlu0 %v478_v8  ;;  %v1842_v55 = vpop.xlane.xlu1 %724  ;;  %v1844_v19 = vpop.xlane.xlu0 %676 }
 0x121   :  { %v777_v12 = vmax.f32 %v1842_v55, 1e-24 }
 0x124   :  { %v1846_v11 = vpop.xlane.xlu1 %727  ;;  %v1848_v41 = vpop.xlane.xlu0 %679 }
 0x128   :  { %v1850_v51 = vpop.xlane.xlu1 %730  ;;  %v1852_v62 = vpop.xlane.xlu0 %682 }
 0x12c   :  { %v1854_v23 = vpop.xlane.xlu1 %733  ;;  %v1856_v48 = vpop.xlane.xlu0 %685 }
 0x130   :  { %v1858_v43 = vpop.xlane.xlu1 %736  ;;  %v1860_v8 = vpop.xlane.xlu0 %688 }
 0x134   :  { %v1862_v58 = vpop.xlane.xlu1 %739  ;;  %v1864_v60 = vpop.xlane.xlu0 %691 }
 0x138   :  { %v1866_v24 = vpop.xlane.xlu1 %742  ;;  %v1868_v42 = vpop.xlane.xlu0 %694 }
 0x13c   :  { %v1870_v49 = vpop.xlane.xlu1 %745  ;;  %v1872_v53 = vpop.xlane.xlu0 %697 }
 0x13d   :  { %2081 = vst [vmem:[#allocation34_spill] sm:$0xff] %v1870_v49  ;;  %2082 = vst [vmem:[#allocation35_spill] sm:$0xff] %v1872_v53  ;;  %v774_v49 = vmax.f32 %v716_v40, 1e-24  ;;  %v758_v53 = vmax.f32 %v668_v63, 1e-24  ;;  %v1886_v63 = vpop.eup %1142 }
 0x13f   :  { %1150 = vrsqrt.f32 %v774_v49  ;;  %v1145_v49 = vpop.eup %1144 }
 0x140   :  { %v1874_v32 = vpop.xlane.xlu1 %748  ;;  %v1876_v29 = vpop.xlane.xlu0 %700  ;;  %1152 = vrsqrt.f32 %v758_v53 }
 0x141   :  { %2083 = vst [vmem:[#allocation36_spill] sm:$0xff] %v1874_v32  ;;  %2084 = vst [vmem:[#allocation37_spill] sm:$0xff] %v1876_v29  ;;  %v775_v32 = vmax.f32 %v719_v44, 1e-24  ;;  %v778_v44 = vmax.f32 %v1846_v11, 1e-24 }
 0x143   :  { %1154 = vrsqrt.f32 %v775_v32 }
 0x144   :  { %v1878_v25 = vpop.xlane.xlu1 %751  ;;  %v1880_v38 = vpop.xlane.xlu0 %703 }
 0x145   :  { %2085 = vst [vmem:[#allocation38_spill] sm:$0xff] %v1878_v25  ;;  %2086 = vst [vmem:[#allocation39_spill] sm:$0xff] %v1880_v38  ;;  %v759_v25 = vmax.f32 %v671_v20, 1e-24 }
 0x148   :  { %v1882_v28 = vpop.xlane.xlu1 %754  ;;  %v1884_v10 = vpop.xlane.xlu0 %706 }
 0x170   :  { %v441_v29 = vpop.xlane.xlu1 %440 }
 0x171   :  { %v533_v38 = vmax.f32 %v441_v29, 1e-24  ;;  %v438_v6 = vpop.xlane.xlu0 %437  ;;  %v1147_v29 = vpop.eup %1146 }
 0x172   :  { %v532_v7 = vmax.f32 %v438_v6, 1e-24  ;;  %v1149_v53 = vpop.eup %1148 }
 0x173   :  { %1156 = vrsqrt.f32 %v533_v38  ;;  %v761_v38 = vmax.f32 %v1844_v19, 1e-24  ;;  %v1890_v1 = vpop.eup %1150  ;;  %v821_v11 = vmul.f32 %v1149_v53, %v1372_v21  ;;  %v763_v21 = vmax.f32 %v1852_v62, 1e-24 }
 0x174   :  { %1158 = vrsqrt.f32 %v532_v7  ;;  %v489_v59 = vpop.xlane.xlu1 %488  ;;  %v1153_v6 = vpop.eup %1152  ;;  %v780_v62 = vmax.f32 %v1854_v23, 1e-24 }
 0x175   :  { %1160 = vrsqrt.f32 %v759_v25  ;;  %v549_v40 = vmax.f32 %v489_v59, 1e-24  ;;  %v447_v18 = vpop.xlane.xlu0 %446  ;;  %v1893_v55 = vpop.eup %1154  ;;  %v762_v59 = vmax.f32 %v1848_v41, 1e-24 }
 0x176   :  { %1162 = vrsqrt.f32 %v776_v22  ;;  %v535_v33 = vmax.f32 %v447_v18, 1e-24 }
 0x177   :  { %1164 = vrsqrt.f32 %v549_v40 }
 0x178   :  { %1166 = vrsqrt.f32 %v535_v33  ;;  %v486_v32 = vpop.xlane.xlu1 %485 }
 0x179   :  { %1168 = vrsqrt.f32 %v760_v2  ;;  %v548_v34 = vmax.f32 %v486_v32, 1e-24  ;;  %v444_v25 = vpop.xlane.xlu0 %443 }
 0x17a   :  { %1170 = vrsqrt.f32 %v777_v12  ;;  %v534_v20 = vmax.f32 %v444_v25, 1e-24 }
 0x17b   :  { %1172 = vrsqrt.f32 %v548_v34  ;;  %v820_v34 = vmul.f32 %v1145_v49, %v1352_v15  ;;  %v837_v15 = vmul.f32 %v1147_v29, %v1357_v16 }
 0x17c   :  { %1174 = vrsqrt.f32 %v534_v20  ;;  %v495_v22 = vpop.xlane.xlu1 %494 }
 0x17d   :  { %v1157_v7 = vpop.eup %1156  ;;  %1176 = vrsqrt.f32 %v761_v38  ;;  %v551_v2 = vmax.f32 %v495_v22, 1e-24  ;;  %v453_v19 = vpop.xlane.xlu0 %452 }
 0x17e   :  { %v1159_v40 = vpop.eup %1158  ;;  %1178 = vrsqrt.f32 %v778_v44  ;;  %v537_v18 = vmax.f32 %v453_v19, 1e-24  ;;  %v597_v12 = vmul.f32 %v1157_v7, %v1682_v30  ;;  %v779_v44 = vmax.f32 %v1850_v51, 1e-24 }
 0x17f   :  { %v1161_v33 = vpop.eup %1160  ;;  %1180 = vrsqrt.f32 %v551_v2  ;;  %v596_v32 = vmul.f32 %v1159_v40, %v1688_v35 }
 0x180   :  { %v1900_v25 = vpop.eup %1162  ;;  %1182 = vrsqrt.f32 %v537_v18  ;;  %v492_v38 = vpop.xlane.xlu1 %491  ;;  %v853_v41 = vmul.f32 %v821_v11, %v597_v12 }
 0x181   :  { %v1165_v20 = vpop.eup %1164  ;;  %1184 = vrsqrt.f32 %v762_v59  ;;  %v550_v22 = vmax.f32 %v492_v38, 1e-24  ;;  %v450_v19 = vpop.xlane.xlu0 %449  ;;  %v852_v30 = vmul.f32 %v820_v34, %v596_v32  ;;  %v823_v59 = vmul.f32 %v1161_v33, %v1422_v37 }
 0x182   :  { %v1167_v7 = vpop.eup %1166  ;;  %v536_v53 = vmax.f32 %v450_v19, 1e-24  ;;  %v613_v35 = vmul.f32 %v1165_v20, %v1684_v31  ;;  %v836_v37 = vmul.f32 %v1886_v63, %v1347_v14  ;;  %v822_v38 = vmul.f32 %v1153_v6, %v1390_v27 }
 0x183   :  { %v1906_v49 = vpop.eup %1168  ;;  %1186 = vrsqrt.f32 %v550_v22  ;;  %884 = vxpose.xlu0.b32.start [1/16] (narrow) %v852_v30, 32  ;;  %v599_v2 = vmul.f32 %v1167_v7, %v1698_v45  ;;  %v764_v19 = vmax.f32 %v1856_v48, 1e-24  ;;  %v765_v63 = vmax.f32 %v1860_v8, 1e-24 }
 0x184   :  { %v1910_v51 = vpop.eup %1170  ;;  %1188 = vrsqrt.f32 %v536_v53  ;;  %v501_v40 = vpop.xlane.xlu1 %500  ;;  %v869_v18 = vmul.f32 %v837_v15, %v613_v35  ;;  %v839_v27 = vmul.f32 %v1893_v55, %v1417_v36  ;;  %v781_v8 = vmax.f32 %v1858_v43, 1e-24 }
 0x185   :  { %v1173_v12 = vpop.eup %1172  ;;  %1190 = vrsqrt.f32 %v779_v44  ;;  %v553_v31 = vmax.f32 %v501_v40, 1e-24  ;;  %v459_v11 = vpop.xlane.xlu0 %458  ;;  %v855_v16 = vmul.f32 %v823_v59, %v599_v2  ;;  %v824_v43 = vmul.f32 %v1906_v49, %v1454_v47 }
 0x186   :  { %v1175_v29 = vpop.eup %1174  ;;  %1192 = vrsqrt.f32 %v763_v21  ;;  %v539_v32 = vmax.f32 %v459_v11, 1e-24  ;;  %v612_v34 = vmul.f32 %v1173_v12, %v1692_v39  ;;  %v841_v47 = vmul.f32 %v1910_v51, %v1481_v56 }
 0x187   :  { %v1177_v45 = vpop.eup %1176  ;;  %1194 = vrsqrt.f32 %v553_v31  ;;  %885 = vxpose.xlu0.b32.cont [2/16] (narrow) %v853_v41, 32  ;;  %v598_v33 = vmul.f32 %v1175_v29, %v1704_v52 }
 0x188   :  { %v1918_v20 = vpop.eup %1178  ;;  %1196 = vrsqrt.f32 %v539_v32  ;;  %v498_v23 = vpop.xlane.xlu1 %497  ;;  %v868_v44 = vmul.f32 %v836_v37, %v612_v34  ;;  %v825_v48 = vmul.f32 %v1177_v45, %v1486_v57 }
 0x189   :  { %v1181_v22 = vpop.eup %1180  ;;  %1198 = vrsqrt.f32 %v780_v62  ;;  %v552_v39 = vmax.f32 %v498_v23, 1e-24  ;;  %v456_v30 = vpop.xlane.xlu0 %455  ;;  %v854_v7 = vmul.f32 %v822_v38, %v598_v33 }
 0x18a   :  { %v1183_v14 = vpop.eup %1182  ;;  %v538_v41 = vmax.f32 %v456_v30, 1e-24  ;;  %916 = vxpose.xlu1.b32.start [1/16] (narrow) %v868_v44, 32  ;;  %v615_v52 = vmul.f32 %v1181_v22, %v1700_v50 }
 0x18b   :  { %v1925_v6 = vpop.eup %1184  ;;  %1200 = vrsqrt.f32 %v552_v39  ;;  %886 = vxpose.xlu0.b32.cont [3/16] (narrow) %v854_v7, 32  ;;  %v601_v21 = vmul.f32 %v1183_v14, %v1714_v61  ;;  %v838_v61 = vmul.f32 %v1890_v1, %v1385_v26  ;;  %v767_v1 = vmax.f32 %v1868_v42, 1e-24 }
 0x18c   :  { %1202 = vrsqrt.f32 %v538_v41  ;;  %v507_v53 = vpop.xlane.xlu1 %506  ;;  %v871_v35 = vmul.f32 %v839_v27, %v615_v52  ;;  %v766_v42 = vmax.f32 %v1864_v60, 1e-24  ;;  %v826_v60 = vmul.f32 %v1925_v6, %v1518_v3 }
 0x18d   :  { %v1187_v15 = vpop.eup %1186  ;;  %1204 = vrsqrt.f32 %v764_v19  ;;  %v555_v2 = vmax.f32 %v507_v53, 1e-24  ;;  %v465_v50 = vpop.xlane.xlu0 %464  ;;  %v857_v59 = vmul.f32 %v825_v48, %v601_v21  ;;  %v2089_v53 = vld [vmem:[#allocation3_spill] sm:$0xff] }
 0x18e   :  { %v1189_v40 = vpop.eup %1188  ;;  %1206 = vrsqrt.f32 %v765_v63  ;;  %v541_v36 = vmax.f32 %v465_v50, 1e-24  ;;  %917 = vxpose.xlu1.b32.cont [2/16] (narrow) %v869_v18, 32  ;;  %v614_v55 = vmul.f32 %v1187_v15, %v1707_v54  ;;  %v782_v18 = vmax.f32 %v1862_v58, 1e-24 }
 0x18f   :  { %v1191_v57 = vpop.eup %1190  ;;  %1208 = vrsqrt.f32 %v555_v2  ;;  %887 = vxpose.xlu0.b32.cont [4/16] (narrow) %v855_v16, 32  ;;  %v600_v12 = vmul.f32 %v1189_v40, %v1720_v4  ;;  %v783_v63 = vmax.f32 %v1866_v24, 1e-24  ;;  %v2092_v40 = vld [vmem:[#allocation35_spill] sm:$0xff] }
 0x190   :  { %v1193_v62 = vpop.eup %1192  ;;  %1210 = vrsqrt.f32 %v541_v36  ;;  %v504_v31 = vpop.xlane.xlu1 %503  ;;  %v870_v11 = vmul.f32 %v838_v61, %v614_v55  ;;  %v843_v3 = vmul.f32 %v1191_v57, %v2089_v53  ;;  %v768_v36 = vmax.f32 %v2092_v40, 1e-24 }
 0x191   :  { %v1195_v29 = vpop.eup %1194  ;;  %1212 = vrsqrt.f32 %v781_v8  ;;  %v554_v54 = vmax.f32 %v504_v31, 1e-24  ;;  %v462_v32 = vpop.xlane.xlu0 %461  ;;  %v856_v34 = vmul.f32 %v824_v43, %v600_v12  ;;  %v827_v58 = vmul.f32 %v1193_v62, %v1550_v13  ;;  %v2091_v8 = vld [vmem:[#allocation7_spill] sm:$0xff]  ;;  %v2093_v62 = vld [vmem:[#allocation17_spill] sm:$0xff] }
 0x192   :  { %v1197_v26 = vpop.eup %1196  ;;  %v540_v16 = vmax.f32 %v462_v32, 1e-24  ;;  %918 = vxpose.xlu1.b32.cont [3/16] (narrow) %v870_v11, 32  ;;  %v617_v4 = vmul.f32 %v1195_v29, %v1716_v0  ;;  %v2094_v11 = vld [vmem:[#allocation2_spill] sm:$0xff] }
 0x193   :  { %v1941_v49 = vpop.eup %1198  ;;  %1214 = vrsqrt.f32 %v554_v54  ;;  %888 = vxpose.xlu0.b32.cont [5/16] (narrow) %v856_v34, 32  ;;  %v603_v37 = vmul.f32 %v1197_v26, %v1728_v9  ;;  %v840_v9 = vmul.f32 %v1900_v25, %v1449_v46  ;;  %v2087_v25 = vld [vmem:[#allocation37_spill] sm:$0xff]  ;;  %v842_v29 = vmul.f32 %v1918_v20, %v2094_v11  ;;  %v2095_v54 = vld [vmem:[#allocation20_spill] sm:$0xff]  ;;  %v2111_v11 = vld [vmem:[#allocation26_spill] sm:$0xff] }
 0x194   :  { %1216 = vrsqrt.f32 %v540_v16  ;;  %v513_v45 = vpop.xlane.xlu1 %512  ;;  %v873_v33 = vmul.f32 %v841_v47, %v617_v4  ;;  %v769_v27 = vmax.f32 %v2087_v25, 1e-24  ;;  %v2096_v34 = vld [vmem:[#allocation5_spill] sm:$0xff] }
 0x195   :  { %v1201_v38 = vpop.eup %1200  ;;  %1218 = vrsqrt.f32 %v782_v18  ;;  %v557_v23 = vmax.f32 %v513_v45, 1e-24  ;;  %v471_v0 = vpop.xlane.xlu0 %470  ;;  %v859_v44 = vmul.f32 %v827_v58, %v603_v37  ;;  %v2097_v37 = vld [vmem:[#allocation36_spill] sm:$0xff] }
 0x196   :  { %v1203_v22 = vpop.eup %1202  ;;  %1220 = vrsqrt.f32 %v767_v1  ;;  %v543_v56 = vmax.f32 %v471_v0, 1e-24  ;;  %919 = vxpose.xlu1.b32.cont [4/16] (narrow) %v871_v35, 32  ;;  %v616_v51 = vmul.f32 %v1201_v38, %v1722_v5  ;;  %v2090_v35 = vld [vmem:[#allocation18_spill] sm:$0xff]  ;;  %v785_v58 = vmax.f32 %v2097_v37, 1e-24 }
 0x197   :  { %v1205_v13 = vpop.eup %1204  ;;  %1222 = vrsqrt.f32 %v557_v23  ;;  %889 = vxpose.xlu0.b32.cont [6/16] (narrow) %v857_v59, 32  ;;  %v602_v19 = vmul.f32 %v1203_v22, %v1733_v17  ;;  %v2088_v17 = vld [vmem:[#allocation16_spill] sm:$0xff]  ;;  %v2098_v23 = vld [vmem:[#allocation19_spill] sm:$0xff] }
 0x198   :  { %v1207_v39 = vpop.eup %1206  ;;  %1224 = vrsqrt.f32 %v543_v56  ;;  %v510_v30 = vpop.xlane.xlu1 %509  ;;  %v872_v7 = vmul.f32 %v840_v9, %v616_v51  ;;  %v828_v26 = vmul.f32 %v1205_v13, %v2096_v34  ;;  %v2100_v51 = vld [vmem:[#allocation22_spill] sm:$0xff]  ;;  %v2101_v13 = vld [vmem:[#allocation11_spill] sm:$0xff]  ;;  %v2113_v37 = vld [vmem:[#allocation8_spill] sm:$0xff] }
 0x199   :  { %v1209_v14 = vpop.eup %1208  ;;  %1226 = vrsqrt.f32 %v766_v42  ;;  %v556_v5 = vmax.f32 %v510_v30, 1e-24  ;;  %v468_v41 = vpop.xlane.xlu0 %467  ;;  %v858_v52 = vmul.f32 %v826_v60, %v602_v19  ;;  %v829_v2 = vmul.f32 %v1207_v39, %v2091_v8 }
 0x19a   :  { %v1211_v46 = vpop.eup %1210  ;;  %v542_v21 = vmax.f32 %v468_v41, 1e-24  ;;  %920 = vxpose.xlu1.b32.cont [5/16] (narrow) %v872_v7, 32  ;;  %v619_v48 = vmul.f32 %v1209_v14, %v2088_v17  ;;  %v2102_v7 = vld [vmem:[#allocation34_spill] sm:$0xff] }
 0x19b   :  { %v1213_v6 = vpop.eup %1212  ;;  %1228 = vrsqrt.f32 %v556_v5  ;;  %890 = vxpose.xlu0.b32.cont [7/16] (narrow) %v858_v52, 32  ;;  %v605_v15 = vmul.f32 %v1211_v46, %v2090_v35  ;;  %v784_v14 = vmax.f32 %v2102_v7, 1e-24  ;;  %v2103_v46 = vld [vmem:[#allocation21_spill] sm:$0xff] }
 0x19c   :  { %1230 = vrsqrt.f32 %v542_v21  ;;  %v519_v24 = vpop.xlane.xlu1 %518  ;;  %v875_v50 = vmul.f32 %v843_v3, %v619_v48  ;;  %v2105_v48 = vld [vmem:[#allocation24_spill] sm:$0xff]  ;;  %v2106_v3 = vld [vmem:[#allocation9_spill] sm:$0xff] }
 0x19d   :  { %v1215_v59 = vpop.eup %1214  ;;  %1232 = vrsqrt.f32 %v783_v63  ;;  %v559_v55 = vmax.f32 %v519_v24, 1e-24  ;;  %v477_v61 = vpop.xlane.xlu0 %476  ;;  %v861_v12 = vmul.f32 %v829_v2, %v605_v15  ;;  %v2107_v15 = vld [vmem:[#allocation38_spill] sm:$0xff] }
 0x19e   :  { %v1217_v43 = vpop.eup %1216  ;;  %1234 = vrsqrt.f32 %v769_v27  ;;  %v545_v57 = vmax.f32 %v477_v61, 1e-24  ;;  %921 = vxpose.xlu1.b32.cont [6/16] (narrow) %v873_v33, 32  ;;  %v618_v31 = vmul.f32 %v1215_v59, %v2093_v62  ;;  %v2104_v27 = vld [vmem:[#allocation4_spill] sm:$0xff]  ;;  %v786_v8 = vmax.f32 %v2107_v15, 1e-24 }
 0x19f   :  { %v1962_v18 = vpop.eup %1218  ;;  %1236 = vrsqrt.f32 %v559_v55  ;;  %891 = vxpose.xlu0.b32.cont [8/16] (narrow) %v859_v44, 32  ;;  %v604_v32 = vmul.f32 %v1217_v43, %v2095_v54  ;;  %v2099_v44 = vld [vmem:[#allocation6_spill] sm:$0xff]  ;;  %v844_v21 = vmul.f32 %v1941_v49, %v2104_v27 }
 0x1a0   :  { %v1221_v1 = vpop.eup %1220  ;;  %1238 = vrsqrt.f32 %v545_v57  ;;  %v516_v16 = vpop.xlane.xlu1 %515  ;;  %v874_v4 = vmul.f32 %v842_v29, %v618_v31  ;;  %v845_v22 = vmul.f32 %v1213_v6, %v2099_v44  ;;  %v2110_v62 = vld [vmem:[#allocation10_spill] sm:$0xff] }
 0x1a1   :  { %v1223_v47 = vpop.eup %1222  ;;  %v558_v45 = vmax.f32 %v516_v16, 1e-24  ;;  %v474_v33 = vpop.xlane.xlu0 %473  ;;  %v860_v38 = vmul.f32 %v828_v26, %v604_v32  ;;  %1240 = vrsqrt.f32 %v768_v36  ;;  %v831_v19 = vmul.f32 %v1221_v1, %v2101_v13  ;;  %v2112_v54 = vld [vmem:[#allocation14_spill] sm:$0xff] }
 0x1a2   :  { %v1225_v42 = vpop.eup %1224  ;;  %v544_v20 = vmax.f32 %v474_v33, 1e-24  ;;  %922 = vxpose.xlu1.b32.cont [7/16] (narrow) %v874_v4, 32  ;;  %v621_v0 = vmul.f32 %v1223_v47, %v2098_v23 }
 0x1a3   :  { %v1227_v56 = vpop.eup %1226  ;;  %1242 = vrsqrt.f32 %v558_v45  ;;  %892 = vxpose.xlu0.b32.cont [9/16] (narrow) %v860_v38, 32  ;;  %v607_v9 = vmul.f32 %v1225_v42, %v2100_v51  ;;  %v771_v38 = vmax.f32 %v1884_v10, 1e-24  ;;  %v2116_v51 = vld [vmem:[#allocation12_spill] sm:$0xff]  ;;  %v2117_v10 = vld [vmem:[#allocation27_spill] sm:$0xff] }
 0x1a4   :  { %1244 = vrsqrt.f32 %v544_v20  ;;  %v525_v60 = vpop.xlane.xlu1 %524  ;;  %v877_v39 = vmul.f32 %v845_v22, %v621_v0  ;;  %v830_v6 = vmul.f32 %v1227_v56, %v2106_v3  ;;  %v2114_v20 = vld [vmem:[#allocation25_spill] sm:$0xff]  ;;  %v2115_v22 = vld [vmem:[#allocation28_spill] sm:$0xff] }
 0x1a5   :  { %v1229_v30 = vpop.eup %1228  ;;  %1246 = vrsqrt.f32 %v785_v58  ;;  %v561_v63 = vmax.f32 %v525_v60, 1e-24  ;;  %v483_v5 = vpop.xlane.xlu0 %482  ;;  %v863_v41 = vmul.f32 %v831_v19, %v607_v9  ;;  %v846_v58 = vmul.f32 %v1962_v18, %v2113_v37  ;;  %v2120_v3 = vld [vmem:[#allocation33_spill] sm:$0xff] }
 0x1a6   :  { %v1231_v52 = vpop.eup %1230  ;;  %923 = vxpose.xlu1.b32.cont [8/16] (narrow) %v875_v50, 32  ;;  %v620_v25 = vmul.f32 %v1229_v30, %v2103_v46  ;;  %v2108_v50 = vld [vmem:[#allocation39_spill] sm:$0xff]  ;;  %v547_v43 = vmax.f32 %v483_v5, 1e-24  ;;  %v787_v19 = vmax.f32 %v1882_v28, 1e-24 }
 0x1a7   :  { %v1233_v17 = vpop.eup %1232  ;;  %1248 = vrsqrt.f32 %v561_v63  ;;  %893 = vxpose.xlu0.b32.cont [10/16] (narrow) %v861_v12, 32  ;;  %v606_v53 = vmul.f32 %v1231_v52, %v2105_v48  ;;  %v770_v40 = vmax.f32 %v2108_v50, 1e-24  ;;  %v2109_v12 = vld [vmem:[#allocation23_spill] sm:$0xff]  ;;  %v2118_v30 = vld [vmem:[#allocation13_spill] sm:$0xff]  ;;  %v1278_v28 = vld [vmem:[%s2015_s1 + $0xe0] sm:$0xff] }
 0x1a8   :  { %v1235_v35 = vpop.eup %1234  ;;  %v522_v2 = vpop.xlane.xlu1 %521  ;;  %v876_v24 = vmul.f32 %v844_v21, %v620_v25  ;;  %1250 = vrsqrt.f32 %v784_v14  ;;  %v847_v31 = vmul.f32 %v1233_v17, %v2110_v62  ;;  %v2119_v52 = vld [vmem:[#allocation29_spill] sm:$0xff]  ;;  %v2124_v62 = vld [vmem:[#allocation31_spill] sm:$0xff] }
 0x1a9   :  { %v1237_v59 = vpop.eup %1236  ;;  %v560_v36 = vmax.f32 %v522_v2, 1e-24  ;;  %v531_v55 = vpop.xlane.xlu0 %530  ;;  %v862_v61 = vmul.f32 %v830_v6, %v606_v53  ;;  %v833_v32 = vmul.f32 %v1235_v35, %v2112_v54  ;;  %v1279_v35 = vld [vmem:[%s2015_s1 + $0xf0] sm:$0xff] }
 0x1aa   :  { %v1239_v49 = vpop.eup %1238  ;;  %924 = vxpose.xlu1.b32.cont [9/16] (narrow) %v876_v24, 32  ;;  %v623_v57 = vmul.f32 %v1237_v59, %v2109_v12  ;;  %v563_v44 = vmax.f32 %v531_v55, 1e-24  ;;  %v1280_v24 = vld [vmem:[%s2015_s1 + $0x70] sm:$0xff]  ;;  %v2123_v12 = vld [vmem:[#allocation15_spill] sm:$0xff] }
 0x1ab   :  { %1252 = vrsqrt.f32 %v560_v36  ;;  %894 = vxpose.xlu0.b32.cont [11/16] (narrow) %v862_v61, 32  ;;  %v609_v29 = vmul.f32 %v1239_v49, %v2111_v11  ;;  %v1241_v34 = vpop.eup %1240  ;;  %v2122_v61 = vld [vmem:[#allocation30_spill] sm:$0xff] }
 0x1ac   :  { %1254 = vrsqrt.f32 %v786_v8  ;;  %v528_v26 = vpop.xlane.xlu1 %527  ;;  %v879_v1 = vmul.f32 %v847_v31, %v623_v57  ;;  %v832_v9 = vmul.f32 %v1241_v34, %v2116_v51  ;;  %v2121_v8 = vld [vmem:[#allocation32_spill] sm:$0xff] }
 0x1ad   :  { %v1243_v16 = vpop.eup %1242  ;;  %1256 = vrsqrt.f32 %v770_v40  ;;  %v562_v4 = vmax.f32 %v528_v26, 1e-24  ;;  %v480_v47 = vpop.xlane.xlu0 %479  ;;  %v865_v45 = vmul.f32 %v833_v32, %v609_v29  ;;  %v1281_v29 = vld [vmem:[%s2015_s1 + $0xf8] sm:$0xff] }
 0x1ae   :  { %v1245_v33 = vpop.eup %1244  ;;  %1258 = vrsqrt.f32 %v547_v43  ;;  %v546_v42 = vmax.f32 %v480_v47, 1e-24  ;;  %925 = vxpose.xlu1.b32.cont [10/16] (narrow) %v877_v39, 32  ;;  %v622_v23 = vmul.f32 %v1243_v16, %v2114_v20 }
 0x1af   :  { %v1247_v0 = vpop.eup %1246  ;;  %1260 = vrsqrt.f32 %v562_v4  ;;  %895 = vxpose.xlu0.b32.cont [12/16] (narrow) %v863_v41, 32  ;;  %v608_v56 = vmul.f32 %v1245_v33, %v2115_v22 }
 0x1b0   :  { %1262 = vrsqrt.f32 %v546_v42  ;;  %v878_v13 = vmul.f32 %v846_v58, %v622_v23  ;;  %v849_v7 = vmul.f32 %v1247_v0, %v2118_v30 }
 0x1b1   :  { %v1249_v18 = vpop.eup %1248  ;;  %v864_v60 = vmul.f32 %v832_v9, %v608_v56  ;;  %1264 = vrsqrt.f32 %v771_v38 }
 0x1b2   :  { %926 = vxpose.xlu1.b32.cont [11/16] (narrow) %v878_v13, 32  ;;  %v625_v39 = vmul.f32 %v1249_v18, %v2117_v10  ;;  %v1251_v14 = vpop.eup %1250  ;;  %1266 = vrsqrt.f32 %v563_v44 }
 0x1b3   :  { %896 = vxpose.xlu0.b32.cont [13/16] (narrow) %v864_v60, 32  ;;  %1268 = vrsqrt.f32 %v787_v19  ;;  %v848_v25 = vmul.f32 %v1278_v28, %v1251_v14 }
 0x1b4   :  { %v881_v63 = vmul.f32 %v849_v7, %v625_v39 }
 0x1b5   :  { %v1253_v5 = vpop.eup %1252 }
 0x1b6   :  { %v1255_v41 = vpop.eup %1254  ;;  %927 = vxpose.xlu1.b32.cont [12/16] (narrow) %v879_v1, 32  ;;  %v624_v46 = vmul.f32 %v1253_v5, %v2119_v52 }
 0x1b7   :  { %v1257_v27 = vpop.eup %1256  ;;  %897 = vxpose.xlu0.b32.cont [14/16] (narrow) %v865_v45, 32  ;;  %v850_v15 = vmul.f32 %v1279_v35, %v1255_v41 }
 0x1b8   :  { %v1259_v21 = vpop.eup %1258  ;;  %v880_v17 = vmul.f32 %v848_v25, %v624_v46  ;;  %v834_v59 = vmul.f32 %v1280_v24, %v1257_v27 }
 0x1b9   :  { %v1261_v48 = vpop.eup %1260  ;;  %v611_v49 = vmul.f32 %v1259_v21, %v2122_v61 }
 0x1ba   :  { %v1263_v53 = vpop.eup %1262  ;;  %928 = vxpose.xlu1.b32.cont [13/16] (narrow) %v880_v17, 32  ;;  %v626_v6 = vmul.f32 %v1261_v48, %v2120_v3 }
 0x1bb   :  { %v610_v2 = vmul.f32 %v1263_v53, %v2121_v8  ;;  %v1265_v50 = vpop.eup %1264 }
 0x1bc   :  { %v882_v40 = vmul.f32 %v850_v15, %v626_v6  ;;  %v1267_v36 = vpop.eup %1266  ;;  %v835_v57 = vmul.f32 %v1265_v50, %v2123_v12 }
 0x1bd   :  { %v866_v55 = vmul.f32 %v834_v59, %v610_v2  ;;  %v1269_v43 = vpop.eup %1268  ;;  %v627_v31 = vmul.f32 %v1267_v36, %v2124_v62 }
 0x1be   :  { %929 = vxpose.xlu1.b32.cont [14/16] (narrow) %v881_v63, 32  ;;  %v867_v11 = vmul.f32 %v835_v57, %v611_v49  ;;  %v851_v54 = vmul.f32 %v1281_v29, %v1269_v43 }
 0x1bf   :  { %898 = vxpose.xlu0.b32.cont [15/16] (narrow) %v866_v55, 32 }
 0x1c0   :  { %v883_v32 = vmul.f32 %v851_v54, %v627_v31 }
 0x1c2   :  { %930 = vxpose.xlu1.b32.cont [15/16] (narrow) %v882_v40, 32 }
 0x1c3   :  { %899 = vxpose.xlu0.b32.end [16/16] (narrow) %v867_v11, 32 }
 0x1c6   :  { %931 = vxpose.xlu1.b32.end [16/16] (narrow) %v883_v32, 32 }
 0x207   :  { %v900_v34 = vpop.trf.xlu0 }
 0x20a   :  { %v932_v26 = vpop.trf.xlu1 }
 0x20b   :  { %v901_v1 = vpop.trf.xlu0 }
 0x20c   :  { %v948_v47 = vadd.f32 %v901_v1, %v900_v34 }
 0x20e   :  { %v933_v16 = vpop.trf.xlu1 }
 0x20f   :  { %v902_v4 = vpop.trf.xlu0  ;;  %v957_v45 = vadd.f32 %v933_v16, %v932_v26 }
 0x210   :  { %v949_v37 = vadd.f32 %v948_v47, %v902_v4 }
 0x212   :  { %v934_v58 = vpop.trf.xlu1 }
 0x213   :  { %v903_v33 = vpop.trf.xlu0  ;;  %v958_v42 = vadd.f32 %v957_v45, %v934_v58 }
 0x214   :  { %v950_v38 = vadd.f32 %v949_v37, %v903_v33 }
 0x216   :  { %v951_v20 = vrot.slane %v950_v38, 4  ;;  %v935_v23 = vpop.trf.xlu1 }
 0x217   :  { %v959_v0 = vadd.f32 %v958_v42, %v935_v23 }
 0x218   :  { %v952_v44 = vadd.f32 %v951_v20, %v950_v38 }
 0x219   :  { %v960_v22 = vrot.slane %v959_v0, 4 }
 0x21a   :  { %v953_v56 = vrot.slane %v952_v44, 2 }
 0x21b   :  { %v961_v51 = vadd.f32 %v960_v22, %v959_v0 }
 0x21c   :  { %v954_v9 = vadd.f32 %v953_v56, %v952_v44 }
 0x21d   :  { %v962_v13 = vrot.slane %v961_v51, 2 }
 0x21e   :  { %v955_v18 = vrot.slane %v954_v9, 1 }
 0x21f   :  { %v963_v19 = vadd.f32 %v962_v13, %v961_v51 }
 0x220   :  { %v956_v60 = vadd.f32 %v955_v18, %v954_v9 }
 0x221   :  { %v964_v10 = vrot.slane %v963_v19, 1 }
 0x222   :  { %v968_v39 = vsub.f32 0.0, %v956_v60 }
 0x223   :  { %v965_v30 = vadd.f32 %v964_v10, %v963_v19 }
 0x224   :  { %v970_v7 = vand.u32 2147483647, %v968_v39  ;;  %v969_v24 = vmax.f32 %v968_v39, 0.0 }
 0x225   :  { %v985_v14 = vand.u32 2147483647, %v965_v30  ;;  %v984_v36 = vmax.f32 %v965_v30, 0.0 }
 0x226   :  { %v971_v63 = vsub.f32 0.0, %v970_v7 }
 0x227   :  { %v986_v5 = vsub.f32 0.0, %v985_v14 }
 0x228   :  { %v972_v41 = vmul.f32 1.442695, %v971_v63 }
 0x229   :  { %v987_v52 = vmul.f32 1.442695, %v986_v5 }
 0x22a   :  { %1270 = vpow2.f32 %v972_v41 }
 0x22b   :  { %1272 = vpow2.f32 %v987_v52 }
 0x234   :  { %v1271_v46 = vpop.eup %1270 }
 0x235   :  { %v1273_v28 = vpop.eup %1272  ;;  %v974_v25 = vadd.f32 1.0, %v1271_v46  ;;  %v977_v21 = vmul.f32 -0.5, %v1271_v46  ;;  %v980_v53 = vand.u32 2147483647, %v1271_v46 }
 0x236   :  { %v989_v27 = vadd.f32 1.0, %v1273_v28  ;;  %v992_v17 = vmul.f32 -0.5, %v1273_v28  ;;  %v995_v6 = vand.u32 2147483647, %v1273_v28 }
 0x237   :  { %1274 = vlog2.f32 %v974_v25  ;;  %v978_v48 = vadd.f32 1.0, %v977_v21  ;;  %vm981_vm1 = vcmp.lt.f32.partialorder %v980_v53, 0.0004427343 }
 0x238   :  { %1276 = vlog2.f32 %v989_v27  ;;  %v993_v3 = vadd.f32 1.0, %v992_v17  ;;  %vm996_vm2 = vcmp.lt.f32.partialorder %v995_v6, 0.0004427343 }
 0x239   :  { %v979_v2 = vmul.f32 %v1271_v46, %v978_v48 }
 0x23a   :  { %v994_v50 = vmul.f32 %v1273_v28, %v993_v3 }
 0x241   :  { %v1275_v35 = vpop.eup %1274 }
 0x242   :  { %v1277_v15 = vpop.eup %1276  ;;  %v976_v8 = vmul.f32 0.6931472, %v1275_v35 }
 0x243   :  { %v991_v59 = vmul.f32 0.6931472, %v1277_v15 }
 0x244   :  { %v982_v40 = vsel %vm981_vm1, %v979_v2, %v976_v8 }
 0x245   :  { %v983_v55 = vadd.f32 %v982_v40, %v969_v24  ;;  %v997_v61 = vsel %vm996_vm2, %v994_v50, %v991_v59 }
 0x246   :  { %v998_v49 = vadd.f32 %v997_v61, %v984_v36 }
 0x248   :  { %v999_v43 = vadd.f32 %v998_v49, %v983_v55 }
 0x24a   :  { %v1000_v12 = vmul.f32 0.5, %v999_v43 }
 0x24c   :  { %1001 = vst [vmem:[%s2016_s3] sm:$0x1] %v1000_v12 }

</bundles_post_ra>
